<compile_context>
chip_gen: v6e
topology: v6e:2x2x1
jax: 0.10.0
libtpu: 0.0.40
codegen_flags: <defaults>
</compile_context>

<pallas_src>
import functools

import jax
import jax.numpy as jnp
from jax.experimental import pallas as pl
from jax.experimental.pallas import tpu as pltpu


# --------------------------------------------------------------------------- #
# Kernel
# --------------------------------------------------------------------------- #
def vae_kernel(xt_ref, epst_ref, encw_ref, encb_ref, decw_ref, decb_ref,
               out_ref, *, latent_size):
    f32 = jnp.float32
    bf16 = jnp.bfloat16
    two_l = 2 * latent_size

    # ---- folded encoder: mulv^T = encW^T @ x^T + encb   -> [2L, TB] ----
    xt = xt_ref[...].astype(bf16)                       # cast on idle VPU
    mulv_t = jnp.dot(encw_ref[...], xt,
                     preferred_element_type=f32) + encb_ref[...]

    # Store mu | log_var rows of the output slab immediately (lane-dense store,
    # ends mulv's live range before the decoder matmul).
    out_ref[:two_l, :] = mulv_t.astype(out_ref.dtype)

    # ---- reparameterize in f32: z = mu + exp(0.5 * logvar) * eps ----
    mu_t = mulv_t[:latent_size, :]
    lv_t = mulv_t[latent_size:, :]
    z_t = mu_t + jnp.exp(0.5 * lv_t) * epst_ref[...].astype(f32)

    # ---- folded decoder: xr^T = decW^T @ z^T + decb   -> [D, TB] ----
    xr_t = jnp.dot(decw_ref[...], z_t.astype(bf16),
                   preferred_element_type=f32) + decb_ref[...]
    out_ref[two_l:, :] = xr_t.astype(out_ref.dtype)


# --------------------------------------------------------------------------- #
# Wrapper
# --------------------------------------------------------------------------- #
def _fold_affine(layers):
    """Fold a chain of affine layers (W [in,out], b [1,out]) into one (W, b)."""
    w, b = layers[0]
    for wi, bi in layers[1:]:
        w = w @ wi
        b = b @ wi + bi
    return w, b


def _pick_batch_tile(batch, max_tile):
    """Batch lives on the lane axis: tile must be a multiple of 128 or == batch."""
    if batch <= max_tile:
        return batch  # one grid step: per-step overhead dominates this workload
    # Split into an even number of 128-aligned tiles so the "parallel" batch axis
    # can shard across both TensorCores on v7x.
    n = 2
    while pl.cdiv(batch, n) > max_tile:
        n += 2
    return pl.cdiv(pl.cdiv(batch, n), 128) * 128


def vae_forward(x, eps, params, *, max_batch_tile=2048):
    """Fused eval-mode VAE forward. Returns (x_recon, mu, logvar)."""
    B, D = x.shape
    latent = params["wmu"].shape[1]
    f32 = jnp.float32
    bf16 = jnp.bfloat16

    # ---- offline (wrapper-side) folding of the purely-affine chains, in f32 ----
    wmulv = jnp.concatenate([params["wmu"], params["wlv"]], axis=1)
    bmulv = jnp.concatenate([params["bmu"], params["blv"]], axis=1)
    enc_w, enc_b = _fold_affine([(params["w1"], params["b1"]),
                                 (params["w2"], params["b2"]),
                                 (wmulv, bmulv)])                 # [D,2L], [1,2L]
    dec_w, dec_b = _fold_affine([(params["wd1"], params["bd1"]),
                                 (params["wd2"], params["bd2"]),
                                 (params["wd3"], params["bd3"])])  # [L,D], [1,D]

    # Batch-on-lanes layout: weights as [out,in] in bf16, biases as [out,1] f32.
    enc_wt = enc_w.T.astype(bf16)        # [2L, D]
    dec_wt = dec_w.T.astype(bf16)        # [D, L]
    enc_bt = enc_b.T.astype(f32)         # [2L, 1]
    dec_bt = dec_b.T.astype(f32)         # [D, 1]

    xt = x.T                             # [D, B]
    epst = eps.T                         # [L, B]

    TB = _pick_batch_tile(B, max_batch_tile)
    grid = (pl.cdiv(B, TB),)

    out_rows = 2 * latent + D            # [ mu | logvar | x_recon ] on sublanes

    in_specs = [
        pl.BlockSpec((D, TB), lambda i: (0, i)),        # x^T batch tile
        pl.BlockSpec((latent, TB), lambda i: (0, i)),   # eps^T batch tile
        pl.BlockSpec(enc_wt.shape, lambda i: (0, 0)),   # VMEM-resident weights
        pl.BlockSpec(enc_bt.shape, lambda i: (0, 0)),
        pl.BlockSpec(dec_wt.shape, lambda i: (0, 0)),
        pl.BlockSpec(dec_bt.shape, lambda i: (0, 0)),
    ]
    out_specs = pl.BlockSpec((out_rows, TB), lambda i: (0, i))
    out_shape = jax.ShapeDtypeStruct((out_rows, B), x.dtype)

    # Advisory cost estimate for XLA's scheduler (folded kernel).
    itemsize = jnp.dtype(x.dtype).itemsize
    flops = 2 * B * (D * 2 * latent + latent * D)
    bytes_accessed = ((x.size + eps.size) * itemsize
                      + (enc_wt.size + dec_wt.size) * 2
                      + (enc_bt.size + dec_bt.size) * 4
                      + B * out_rows * itemsize)
    cost = pl.CostEstimate(flops=flops, transcendentals=B * latent,
                           bytes_accessed=int(bytes_accessed))

    out = pl.pallas_call(
        functools.partial(vae_kernel, latent_size=latent),
        out_shape=out_shape,
        grid=grid,
        in_specs=in_specs,
        out_specs=out_specs,
        compiler_params=pltpu.CompilerParams(
            dimension_semantics=("parallel",)),
        cost_estimate=cost,
    )(xt, epst, enc_wt, enc_bt, dec_wt, dec_bt)

    mu = out[:latent, :].T
    logvar = out[latent:2 * latent, :].T
    x_recon = out[2 * latent:, :].T
    return x_recon, mu, logvar


# --------------------------------------------------------------------------- #
# Params (PyTorch-Linear-style init; weights stored as [in, out])
# --------------------------------------------------------------------------- #
def init_params(key, input_size, hidden_size, latent_size, dtype=jnp.float32):
    def linear(k, fan_in, fan_out):
        kw, kb = jax.random.split(k)
        bound = 1.0 / jnp.sqrt(float(fan_in))
        w = jax.random.uniform(kw, (fan_in, fan_out), dtype, -bound, bound)
        b = jax.random.uniform(kb, (1, fan_out), dtype, -bound, bound)
        return w, b

    ks = jax.random.split(key, 7)
    h, h2 = hidden_size, hidden_size * 2
    w1, b1 = linear(ks[0], input_size, h)
    w2, b2 = linear(ks[1], h, h2)
    wmu, bmu = linear(ks[2], h2, latent_size)
    wlv, blv = linear(ks[3], h2, latent_size)
    wd1, bd1 = linear(ks[4], latent_size, h)
    wd2, bd2 = linear(ks[5], h, h2)
    wd3, bd3 = linear(ks[6], h2, input_size)
    return dict(w1=w1, b1=b1, w2=w2, b2=b2, wmu=wmu, bmu=bmu, wlv=wlv, blv=blv,
                wd1=wd1, bd1=bd1, wd2=wd2, bd2=bd2, wd3=wd3, bd3=bd3)


if __name__ == "__main__":
    input_size, hidden_size, latent_size = 16, 32, 8
    batch = 64

    root = jax.random.PRNGKey(0)
    k_params, k_x, k_eps = jax.random.split(root, 3)

    params = init_params(k_params, input_size, hidden_size, latent_size)
    x = jax.random.normal(k_x, (batch, input_size), jnp.float32)
    eps = jax.random.normal(k_eps, (batch, latent_size), jnp.float32)

    x_recon, mu, logvar = vae_forward(x, eps, params)
    jax.block_until_ready((x_recon, mu, logvar))

    # ---- Reference 1: exact module semantics (f32, unfolded, eval-mode) ----
    h1 = x @ params["w1"] + params["b1"]
    h2 = h1 @ params["w2"] + params["b2"]
    mu_ref = h2 @ params["wmu"] + params["bmu"]
    lv_ref = h2 @ params["wlv"] + params["blv"]
    z_ref = mu_ref + jnp.exp(0.5 * lv_ref) * eps
    xr_ref = ((z_ref @ params["wd1"] + params["bd1"]) @ params["wd2"]
              + params["bd2"]) @ params["wd3"] + params["bd3"]

    assert jnp.allclose(mu, mu_ref, atol=5e-2, rtol=5e-2)
    assert jnp.allclose(logvar, lv_ref, atol=5e-2, rtol=5e-2)
    assert jnp.allclose(x_recon, xr_ref, atol=5e-2, rtol=5e-2)

    # ---- Reference 2: matched bf16/folded math (tight check of kernel arithmetic) ----
    bf16 = jnp.bfloat16
    wmulv = jnp.concatenate([params["wmu"], params["wlv"]], axis=1)
    bmulv = jnp.concatenate([params["bmu"], params["blv"]], axis=1)
    enc_w, enc_b = _fold_affine([(params["w1"], params["b1"]),
                                 (params["w2"], params["b2"]),
                                 (wmulv, bmulv)])
    dec_w, dec_b = _fold_affine([(params["wd1"], params["bd1"]),
                                 (params["wd2"], params["bd2"]),
                                 (params["wd3"], params["bd3"])])
    mulv_m = jnp.dot(x.astype(bf16), enc_w.astype(bf16),
                     preferred_element_type=jnp.float32) + enc_b
    mu_m, lv_m = mulv_m[:, :latent_size], mulv_m[:, latent_size:]
    z_m = mu_m + jnp.exp(0.5 * lv_m) * eps
    xr_m = jnp.dot(z_m.astype(bf16), dec_w.astype(bf16),
                   preferred_element_type=jnp.float32) + dec_b

    assert jnp.allclose(mu, mu_m, atol=5e-3, rtol=5e-3)
    assert jnp.allclose(logvar, lv_m, atol=5e-3, rtol=5e-3)
    assert jnp.allclose(x_recon, xr_m, atol=5e-3, rtol=5e-3)

    assert x_recon.shape == (batch, input_size)
    assert mu.shape == (batch, latent_size) and logvar.shape == (batch, latent_size)

    print("KERNEL_OK")
</pallas_src>

<mosaic_0001>
module attributes {stable_mosaic.version = 11 : i64} {
  func.func @vae_kernel(%arg0: i32, %arg1: memref<16x64xf32, #tpu.memory_space<vmem>>, %arg2: memref<8x64xf32, #tpu.memory_space<vmem>>, %arg3: memref<16x16xbf16, #tpu.memory_space<vmem>>, %arg4: memref<16x1xf32, #tpu.memory_space<vmem>>, %arg5: memref<16x8xbf16, #tpu.memory_space<vmem>>, %arg6: memref<16x1xf32, #tpu.memory_space<vmem>>, %arg7: memref<32x64xf32, #tpu.memory_space<vmem>>) attributes {dimension_semantics = [#tpu.dimension_semantics<parallel>], iteration_bounds = array<i64: 1>, scalar_prefetch = 0 : i64, scratch_operands = 0 : i64, tpu.core_type = #tpu.core_type<tc>, window_params = [{transform_indices = @transform_0, window_bounds = array<i64: 16, 64>}, {transform_indices = @transform_1, window_bounds = array<i64: 8, 64>}, {pipeline_mode = #tpu.pipeline_mode<synchronous>, transform_indices = @transform_2, window_bounds = array<i64: 16, 16>}, {pipeline_mode = #tpu.pipeline_mode<synchronous>, transform_indices = @transform_3, window_bounds = array<i64: 16, 1>}, {pipeline_mode = #tpu.pipeline_mode<synchronous>, transform_indices = @transform_4, window_bounds = array<i64: 16, 8>}, {pipeline_mode = #tpu.pipeline_mode<synchronous>, transform_indices = @transform_5, window_bounds = array<i64: 16, 1>}, {transform_indices = @transform_6, window_bounds = array<i64: 32, 64>}]} {
    %c0 = arith.constant 0 : index
    %c0_0 = arith.constant 0 : index
    %0 = vector.load %arg1[%c0, %c0_0] : memref<16x64xf32, #tpu.memory_space<vmem>>, vector<16x64xf32>
    %1 = arith.truncf %0 : vector<16x64xf32> to vector<16x64xbf16>
    %c0_1 = arith.constant 0 : index
    %c0_2 = arith.constant 0 : index
    %2 = vector.load %arg3[%c0_1, %c0_2] : memref<16x16xbf16, #tpu.memory_space<vmem>>, vector<16x16xbf16>
    %cst = arith.constant dense<0.000000e+00> : vector<16x64xf32>
    %3 = tpu.matmul %2, %1, %cst {dimension_numbers = #tpu.dot_dimension_numbers<[1], [0], [0], [1], [0, 0, 1, 1], [], []>} : vector<16x16xbf16>, vector<16x64xbf16>, vector<16x64xf32> -> vector<16x64xf32>
    %c0_3 = arith.constant 0 : index
    %c0_4 = arith.constant 0 : index
    %4 = vector.load %arg4[%c0_3, %c0_4] : memref<16x1xf32, #tpu.memory_space<vmem>>, vector<16x1xf32>
    %5 = vector.broadcast %4 : vector<16x1xf32> to vector<16x64xf32>
    %6 = arith.addf %3, %5 : vector<16x64xf32>
    %c0_5 = arith.constant 0 : index
    %c0_6 = arith.constant 0 : index
    %7 = vector.load %arg7[%c0_5, %c0_6] : memref<32x64xf32, #tpu.memory_space<vmem>>, vector<16x64xf32>
    tpu.vector_store %arg7[%c0_5, %c0_6], %6 {strides = array<i32>} : memref<32x64xf32, #tpu.memory_space<vmem>>, vector<16x64xf32>,
    %8 = vector.extract_strided_slice %6 {offsets = [0, 0], sizes = [8, 64], strides = [1, 1]} : vector<16x64xf32> to vector<8x64xf32>
    %9 = vector.extract_strided_slice %6 {offsets = [8, 0], sizes = [8, 64], strides = [1, 1]} : vector<16x64xf32> to vector<8x64xf32>
    %cst_7 = arith.constant 5.000000e-01 : f32
    %10 = vector.broadcast %cst_7 : f32 to vector<8x64xf32>
    %11 = arith.mulf %10, %9 : vector<8x64xf32>
    %12 = math.exp %11 : vector<8x64xf32>
    %c0_8 = arith.constant 0 : index
    %c0_9 = arith.constant 0 : index
    %13 = vector.load %arg2[%c0_8, %c0_9] : memref<8x64xf32, #tpu.memory_space<vmem>>, vector<8x64xf32>
    %14 = arith.mulf %12, %13 : vector<8x64xf32>
    %15 = arith.addf %8, %14 : vector<8x64xf32>
    %c0_10 = arith.constant 0 : index
    %c0_11 = arith.constant 0 : index
    %16 = vector.load %arg5[%c0_10, %c0_11] : memref<16x8xbf16, #tpu.memory_space<vmem>>, vector<16x8xbf16>
    %17 = arith.truncf %15 : vector<8x64xf32> to vector<8x64xbf16>
    %cst_12 = arith.constant dense<0.000000e+00> : vector<16x64xf32>
    %18 = tpu.matmul %16, %17, %cst_12 {dimension_numbers = #tpu.dot_dimension_numbers<[1], [0], [0], [1], [0, 0, 1, 1], [], []>} : vector<16x8xbf16>, vector<8x64xbf16>, vector<16x64xf32> -> vector<16x64xf32>
    %c0_13 = arith.constant 0 : index
    %c0_14 = arith.constant 0 : index
    %19 = vector.load %arg6[%c0_13, %c0_14] : memref<16x1xf32, #tpu.memory_space<vmem>>, vector<16x1xf32>
    %20 = vector.broadcast %19 : vector<16x1xf32> to vector<16x64xf32>
    %21 = arith.addf %18, %20 : vector<16x64xf32>
    %c16 = arith.constant 16 : index
    %c0_15 = arith.constant 0 : index
    %22 = vector.load %arg7[%c16, %c0_15] : memref<32x64xf32, #tpu.memory_space<vmem>>, vector<16x64xf32>
    tpu.vector_store %arg7[%c16, %c0_15], %21 {strides = array<i32>} : memref<32x64xf32, #tpu.memory_space<vmem>>, vector<16x64xf32>,
    return
  }
  func.func @transform_0(%arg0: i32) -> (i32, i32) {
    %c0_i32 = arith.constant 0 : i32
    %c0_i32_0 = arith.constant 0 : i32
    return %c0_i32, %arg0 : i32, i32
  }
  func.func @transform_1(%arg0: i32) -> (i32, i32) {
    %c0_i32 = arith.constant 0 : i32
    %c0_i32_0 = arith.constant 0 : i32
    return %c0_i32, %arg0 : i32, i32
  }
  func.func @transform_2(%arg0: i32) -> (i32, i32) {
    %c0_i32 = arith.constant 0 : i32
    %c0_i32_0 = arith.constant 0 : i32
    %c0_i32_1 = arith.constant 0 : i32
    return %c0_i32, %c0_i32_0 : i32, i32
  }
  func.func @transform_3(%arg0: i32) -> (i32, i32) {
    %c0_i32 = arith.constant 0 : i32
    %c0_i32_0 = arith.constant 0 : i32
    %c0_i32_1 = arith.constant 0 : i32
    return %c0_i32, %c0_i32_0 : i32, i32
  }
  func.func @transform_4(%arg0: i32) -> (i32, i32) {
    %c0_i32 = arith.constant 0 : i32
    %c0_i32_0 = arith.constant 0 : i32
    %c0_i32_1 = arith.constant 0 : i32
    return %c0_i32, %c0_i32_0 : i32, i32
  }
  func.func @transform_5(%arg0: i32) -> (i32, i32) {
    %c0_i32 = arith.constant 0 : i32
    %c0_i32_0 = arith.constant 0 : i32
    %c0_i32_1 = arith.constant 0 : i32
    return %c0_i32, %c0_i32_0 : i32, i32
  }
  func.func @transform_6(%arg0: i32) -> (i32, i32) {
    %c0_i32 = arith.constant 0 : i32
    %c0_i32_0 = arith.constant 0 : i32
    return %c0_i32, %arg0 : i32, i32
  }
}

</mosaic_0001>

<bundles_post_ra>
// kernel: tpu_custom_call.1
= control target key start
LH: loop header
LB: loop body
LE: loop exit
PB: predicated region body
PF: predicated region fallthrough
CT: control target
= control target key end

     0   :  { %v242_v2 = vmov 0.0   ;;  %vm243_vm0 = vmmov 0   ;;  %v244_v6 = vmov 0   ;;  %vm47_vm1 = vcmask 130048   ;;  %s317_s0 = inlined_call_operand.vmem [shape: f32[16,64], index: 0, kind: input, shape index: {}]   ;;  %s318_s1 = inlined_call_operand.vmem [shape: f32[8,64], index: 1, kind: input, shape index: {}]   ;;  %s319_s2 = inlined_call_operand.vmem [shape: bf16[16,16], index: 2, kind: input, shape index: {}]   ;;  %s320_s3 = inlined_call_operand.vmem [shape: f32[16,1], index: 3, kind: input, shape index: {}]   ;;  %s321_s4 = inlined_call_operand.vmem [shape: bf16[16,8], index: 4, kind: input, shape index: {}]   ;;  %s322_s5 = inlined_call_operand.vmem [shape: f32[16,1], index: 5, kind: input, shape index: {}]   ;;  %s323_s6 = inlined_call_operand.hbm [shape: f32[32,64], index: 6, kind: output, shape index: {}]  }
   0x1   :  { %v25_v0 = vld [vmem:[%s317_s0] sm:$0xff]  ;;  %v26_v1 = vld [vmem:[%s317_s0 + $0x8] sm:$0xff]  ;;  %196 = vmatprep.subr.bf16.mxu0 %v242_v2  ;;  %198 = vmatprep.mubr.msk.bf16.mxu0 %vm243_vm0, %v242_v2 }
   0x2   :  { %v27_v3 = vpack.c.bf16 %v26_v1, %v25_v0  ;;  %v31_v4 = vld [vmem:[%s320_s3 + $0x8] sm:$0xff]  ;;  %v216_v5 = vld [vmem:[%s319_s2] sm:$0xff]   ;;  %214 = vset.pattern.permute.xlu0 %v244_v6  ;;  %202 = vmatprep.subr.bf16.mxu1 %v242_v2 }
   0x3   :  { %39 = vperm.xlu0 %214, %v31_v4  }
   0x4   :  { %197 = vmatpush3.bf16.msra.mxu0 %v27_v3 }
   0x5   :  { %11 = vsyncpa [#allocation3], 0  ;;  %v30_v7 = vld [vmem:[%s320_s3] sm:$0xff]  ;;  %204 = vmatprep.mubr.msk.bf16.mxu1 %vm243_vm0, %v242_v2  ;;  %215 = vset.pattern.permute.xlu1 %v244_v6  ;;  %v105_v9 = vld [vmem:[%s322_s5 + $0x8] sm:$0xff]  ;;  %vm92_vm2 = vcmask 523264   ;;  %vm125_vm3 = vcmask 1043456  }
   0x6   :  { %v104_v8 = vld [vmem:[%s322_s5] sm:$0xff]  ;;  %vm121_vm4 = vcmask 64512   ;;  %s245_s11 = smov [#allocation2]  }
   0x7   :  { %199 = vmatmul.mubr.msk.bf16.vlgmr.msra.gmra.mxu0 %vm47_vm1, %v216_v5  ;;  %34 = vperm.xlu0 %214, %v30_v7   ;;  %v98_v20 = vld [vmem:[%s318_s1] sm:$0xff]  ;;  %s177_s12 = sshll.u32 %s245_s11, 4  ;;  %s178_s12 = int_to_ptr.vmem [resolvable:$true] %s177_s12 }
   0x8   :  { %108 = vperm.xlu1 %215, %v104_v8   ;;  %v217_v26 = vld [vmem:[%s321_s4] sm:$0xff]   ;;  %s220_s1 = scalar_lea.vmem %s178_s12, 512  ;;  %p225_p1 = scmp.lt.s32.totalorder %s178_s12, %s178_s12 }
   0x9   :  { %p221_p0 = scmp.ne.s32.totalorder %s178_s12, %s220_s1  ;;  %p226_p2 = scmp.lt.s32.totalorder %s220_s1, %s220_s1 }
   0xb   :  { %p227_p3 = por %p226_p2, %p225_p1 }
   0xc   :  { %113 = vperm.xlu1 %215, %v105_v9  }
   0xd   :  { %p228_p4 = pnand %p227_p3, %p221_p0 }
  0x7e   :  { %v40_v10 = vpop.permute.xlu0 %39 }
  0x82   :  { %v35_v11 = vpop.permute.xlu0 %34 }
  0x83   :  { %v109_v27 = vpop.permute.xlu1 %108 }
  0x87   :  { %v114_v31 = vpop.permute.xlu1 %113 }
  0xc7   :  { %v85_v12 = vpop.f32.mrf.mxu0 }
  0xc8   :  { %v86_v13 = vadd.f32 %v85_v12, %v35_v11 }
  0xc9   :  { %v200_v14 = vpop.f32.mrf.mxu0 }
  0xca   :  { %93 = vst.msk [vmem:[#allocation2] sm:$0xff] %vm92_vm2, %v86_v13 }
  0xcb   :  { %v88_v15 = vpop.f32.mrf.mxu0 }
  0xcc   :  { %v89_v16 = vadd.f32 %v88_v15, %v40_v10 }
  0xcd   :  { %v201_v17 = vpop.f32.mrf.mxu0 }
  0xce   :  { %94 = vst.msk [vmem:[#allocation2 + $0x8] sm:$0xff] %vm92_vm2, %v89_v16  ;;  %v95_v18 = vmul.f32 0.5, %v89_v16 }
  0xd0   :  { %v96_v19 = vmul.f32 1.442695, %v95_v18 }
  0xd2   :  { %218 = vpow2.f32 %v96_v19 }
  0xdf   :  { %v219_v21 = vpop.eup %218 }
  0xe0   :  { %v99_v22 = vmul.f32 %v219_v21, %v98_v20 }
  0xe2   :  { %v100_v23 = vadd.f32 %v99_v22, %v86_v13 }
  0xe4   :  { %v103_v24 = vpack.c.bf16 %v100_v23, %v100_v23 }
  0xe6   :  { %v127_v25 = vsel %vm125_vm3, %v103_v24, 0 }
  0xe7   :  { %203 = vmatpush3.bf16.msra.mxu1 %v127_v25 }
  0xea   :  { %205 = vmatmul.mubr.msk.bf16.vlgmr.msra.gmra.mxu1 %vm121_vm4, %v217_v26 }
 0x1aa   :  { %v163_v28 = vpop.f32.mrf.mxu1 }
 0x1ab   :  { %v164_v29 = vadd.f32 %v163_v28, %v109_v27 }
 0x1ac   :  { %v206_v30 = vpop.f32.mrf.mxu1 }
 0x1ad   :  { %170 = vst.msk [vmem:[#allocation2 + $0x10] sm:$0xff] %vm92_vm2, %v164_v29 }
 0x1ae   :  { %v166_v32 = vpop.f32.mrf.mxu1 }
 0x1af   :  { %v167_v33 = vadd.f32 %v166_v32, %v114_v31 }
 0x1b0   :  { %v207_v34 = vpop.f32.mrf.mxu1 }
 0x1b1   :  { %171 = vst.msk [vmem:[#allocation2 + $0x18] sm:$0xff] %vm92_vm2, %v167_v33 }
 0x1b2   :  { %231 = shalt.err (!%p228_p4)
}
 0x1b3   :  { %s246_s4 = smov 128   ;;  %s247_s13 = smov 8  }
 0x1b4   :  { %183 = dma.vmem_to_hbm [thread:$0]  %s178_s12, 512, %s323_s6, [#allocation3], %s246_s4, %s246_s4, %s247_s13  }
 0x1b5   :  { %240 = dma.done.wait [#allocation3], 512  }
 0x1b6   :  { %241 = vsyncadd [#allocation3], 4294966784 }
 0x1b7   :  { %187 = vsyncpa [#allocation3], 1 }

</bundles_post_ra>
